<compile_context>
chip_gen: v7x
topology: tpu7x:2x2x1
jax: 0.10.0
libtpu: 0.0.40
codegen_flags: <defaults>
</compile_context>

<pallas_src>
import math

import jax
import jax.numpy as jnp
from jax import lax
from jax.experimental import pallas as pl
from jax.experimental.pallas import tpu as pltpu


def _posw_linear_kernel(x_ref, w_ref, b_ref, o_ref):
    # |W| on the VPU (free under MXU/DMA slack); MXU matmul contracting K
    # against both operands' native layouts, producing a lane-dense (N, tm)
    # block; bias (N, 1) broadcasts across lanes (one VALU add per vreg).
    w_abs = jnp.abs(w_ref[...])                                  # (N, K)
    acc = lax.dot_general(
        w_abs, x_ref[...],
        dimension_numbers=(((1,), (1,)), ((), ())),              # (N,K)x(tm,K) -> (N,tm)
        preferred_element_type=jnp.float32)
    o_ref[...] = (acc + b_ref[...]).astype(o_ref.dtype)


def _round_up(x, m):
    return ((x + m - 1) // m) * m


def _choose_tile(M, tm_max):
    """Pick (tm, grid_m).

    Single full block when M fits (block dims equal to the full array dims are
    always legal, even unaligned).  Otherwise tm is a multiple of 128 so the
    lane-dense (N, tm) output blocks are full, unmasked stores, and we try to
    keep the realized grid-step count even so v7x's two TensorCores split the
    "parallel" axis evenly (harmless on single-TC v5e/v6e).
    """
    if M <= tm_max:
        return M, 1
    steps = 2 * pl.cdiv(pl.cdiv(M, tm_max), 2)          # even target step count
    tm = _round_up(pl.cdiv(M, steps), 128)
    grid_m = pl.cdiv(M, tm)
    # Rounding tm up to 128 can make the realized step count odd again; nudge
    # tm upward (VMEM footprint at K=40 is tiny) until even or single block.
    for _ in range(8):
        if grid_m <= 1 or grid_m % 2 == 0:
            break
        tm += 128
        grid_m = pl.cdiv(M, tm)
    return tm, grid_m


def posw_linear(x, weight, bias, *, tm_max=4096):
    """y = x @ |weight|^T + bias, x of shape (..., in_features)."""
    *lead, K = x.shape
    N, K_w = weight.shape
    assert K == K_w, (K, K_w)
    M = math.prod(lead) if lead else 1

    x2d = x.reshape(M, K)
    b2d = bias.reshape(N, 1)

    tm, grid_m = _choose_tile(M, tm_max)

    flops = 2 * M * K * N
    bytes_accessed = 4 * (M * K + N * K + N + M * N)

    out_nm = pl.pallas_call(
        _posw_linear_kernel,
        out_shape=jax.ShapeDtypeStruct((N, M), x.dtype),
        grid=(grid_m,),
        in_specs=[
            pl.BlockSpec((tm, K), lambda i: (i, 0)),   # x: streamed over M
            pl.BlockSpec((N, K), lambda i: (0, 0)),    # weight: VMEM-resident
            pl.BlockSpec((N, 1), lambda i: (0, 0)),    # bias: VMEM-resident
        ],
        out_specs=pl.BlockSpec((N, tm), lambda i: (0, i)),   # lane-dense output
        compiler_params=pltpu.CompilerParams(
            dimension_semantics=("parallel",)),
        cost_estimate=pl.CostEstimate(
            flops=flops, transcendentals=0, bytes_accessed=bytes_accessed),
    )(x2d, weight, b2d)

    # Layout plumbing back to the public (..., N) contract.
    return out_nm.T.reshape(*lead, N)


def init_posw_linear_params(key, in_features, out_features):
    """Deterministic init matching PyTorch's reset_parameters():
    kaiming_uniform_(a=sqrt(5)) => U(-1/sqrt(fan_in), 1/sqrt(fan_in)) for both
    weight and bias."""
    kw, kb = jax.random.split(key)
    bound = 1.0 / math.sqrt(in_features)
    weight = jax.random.uniform(
        kw, (out_features, in_features), jnp.float32, minval=-bound, maxval=bound)
    bias = jax.random.uniform(
        kb, (out_features,), jnp.float32, minval=-bound, maxval=bound)
    return weight, bias


if __name__ == "__main__":
    # Small shapes consistent with the EI-RNN usage:
    # seq=8, batch=2, in_features=40 (e_size for hidden=50, e_prop=0.8), out=3.
    seq_len, batch, in_features, out_features = 8, 2, 40, 3

    key = jax.random.PRNGKey(0)
    kx, kp = jax.random.split(key)
    x = jax.random.normal(kx, (seq_len, batch, in_features), jnp.float32)
    weight, bias = init_posw_linear_params(kp, in_features, out_features)

    y = jax.block_until_ready(posw_linear(x, weight, bias))
    y_ref = jnp.einsum("sbi,oi->sbo", x, jnp.abs(weight)) + bias
    assert y.shape == (seq_len, batch, out_features)
    assert jnp.allclose(y, y_ref, atol=1e-5, rtol=1e-5)

    # Odd-M single-block path (M=15, no padding anywhere).
    x_odd = jax.random.normal(kx, (5, 3, in_features), jnp.float32)
    y_odd = jax.block_until_ready(posw_linear(x_odd, weight, bias))
    y_odd_ref = jnp.einsum("sbi,oi->sbo", x_odd, jnp.abs(weight)) + bias
    assert jnp.allclose(y_odd, y_odd_ref, atol=1e-5, rtol=1e-5)

    # Tiled path: M=630 > tm_max -> ragged last block, even-step grid.
    big_x = jax.random.normal(kx, (70, 9, in_features), jnp.float32)
    y_big = jax.block_until_ready(posw_linear(big_x, weight, bias, tm_max=256))
    y_big_ref = jnp.einsum("sbi,oi->sbo", big_x, jnp.abs(weight)) + bias
    assert jnp.allclose(y_big, y_big_ref, atol=1e-5, rtol=1e-5)

    print("KERNEL_OK")
</pallas_src>

<mosaic_0001>
module attributes {stable_mosaic.version = 11 : i64} {
  func.func @_posw_linear_kernel(%arg0: i32, %arg1: memref<16x40xf32, #tpu.memory_space<vmem>>, %arg2: memref<3x40xf32, #tpu.memory_space<vmem>>, %arg3: memref<3x1xf32, #tpu.memory_space<vmem>>, %arg4: memref<3x16xf32, #tpu.memory_space<vmem>>) attributes {dimension_semantics = [#tpu.dimension_semantics<parallel>], iteration_bounds = array<i64: 1>, scalar_prefetch = 0 : i64, scratch_operands = 0 : i64, tpu.core_type = #tpu.core_type<tc>, window_params = [{transform_indices = @transform_0, window_bounds = array<i64: 16, 40>}, {pipeline_mode = #tpu.pipeline_mode<synchronous>, transform_indices = @transform_1, window_bounds = array<i64: 3, 40>}, {pipeline_mode = #tpu.pipeline_mode<synchronous>, transform_indices = @transform_2, window_bounds = array<i64: 3, 1>}, {transform_indices = @transform_3, window_bounds = array<i64: 3, 16>}]} {
    %c0 = arith.constant 0 : index
    %c0_0 = arith.constant 0 : index
    %0 = vector.load %arg2[%c0, %c0_0] : memref<3x40xf32, #tpu.memory_space<vmem>>, vector<3x40xf32>
    %1 = math.absf %0 : vector<3x40xf32>
    %c0_1 = arith.constant 0 : index
    %c0_2 = arith.constant 0 : index
    %2 = vector.load %arg1[%c0_1, %c0_2] : memref<16x40xf32, #tpu.memory_space<vmem>>, vector<16x40xf32>
    %cst = arith.constant dense<0.000000e+00> : vector<3x16xf32>
    %3 = tpu.matmul %1, %2, %cst {dimension_numbers = #tpu.dot_dimension_numbers<[1], [1], [0], [0], [0, 0, 1, 0], [], []>} : vector<3x40xf32>, vector<16x40xf32>, vector<3x16xf32> -> vector<3x16xf32>
    %c0_3 = arith.constant 0 : index
    %c0_4 = arith.constant 0 : index
    %4 = vector.load %arg3[%c0_3, %c0_4] : memref<3x1xf32, #tpu.memory_space<vmem>>, vector<3x1xf32>
    %5 = vector.broadcast %4 : vector<3x1xf32> to vector<3x16xf32>
    %6 = arith.addf %3, %5 : vector<3x16xf32>
    %c0_5 = arith.constant 0 : index
    %c0_6 = arith.constant 0 : index
    %7 = vector.load %arg4[%c0_5, %c0_6] : memref<3x16xf32, #tpu.memory_space<vmem>>, vector<3x16xf32>
    tpu.vector_store %arg4[%c0_5, %c0_6], %6 {strides = array<i32>} : memref<3x16xf32, #tpu.memory_space<vmem>>, vector<3x16xf32>,
    return
  }
  func.func @transform_0(%arg0: i32) -> (i32, i32) {
    %c0_i32 = arith.constant 0 : i32
    %c0_i32_0 = arith.constant 0 : i32
    return %arg0, %c0_i32 : i32, i32
  }
  func.func @transform_1(%arg0: i32) -> (i32, i32) {
    %c0_i32 = arith.constant 0 : i32
    %c0_i32_0 = arith.constant 0 : i32
    %c0_i32_1 = arith.constant 0 : i32
    return %c0_i32, %c0_i32_0 : i32, i32
  }
  func.func @transform_2(%arg0: i32) -> (i32, i32) {
    %c0_i32 = arith.constant 0 : i32
    %c0_i32_0 = arith.constant 0 : i32
    %c0_i32_1 = arith.constant 0 : i32
    return %c0_i32, %c0_i32_0 : i32, i32
  }
  func.func @transform_3(%arg0: i32) -> (i32, i32) {
    %c0_i32 = arith.constant 0 : i32
    %c0_i32_0 = arith.constant 0 : i32
    return %c0_i32, %arg0 : i32, i32
  }
}

</mosaic_0001>

<bundles_post_ra>
// kernel: tpu_custom_call.1
= control target key start
LH: loop header
LB: loop body
LE: loop exit
PB: predicated region body
PF: predicated region fallthrough
CT: control target
= control target key end

     0   :  { %8 = vsyncpa [#allocation3], 0  ;;  %s268_s0 = inlined_call_operand.hbm [shape: f32[16,40], index: 0, kind: input, shape index: {}]   ;;  %s269_s1 = inlined_call_operand.vmem [shape: f32[3,40], index: 1, kind: input, shape index: {}]   ;;  %s270_s2 = inlined_call_operand.vmem [shape: f32[3,1], index: 2, kind: input, shape index: {}]   ;;  %s271_s3 = inlined_call_operand.hbm [shape: f32[3,16], index: 3, kind: output, shape index: {}]  }
   0x1   :  { %9 = vsyncpa [#allocation4], 0  ;;  %s210_s12 = smov [#allocation2]   ;;  %s162_s16 = scalar_lea.hbm %s268_s0, 256 }
   0x2   :  { %s15_s13 = sshll.u32 %s210_s12, 4  ;;  %p163_p0 = scmp.ne.s32.totalorder %s268_s0, %s162_s16  ;;  %s16_s13 = int_to_ptr.vmem [resolvable:$true] %s15_s13 }
   0x3   :  { %p166_p1 = scmp.lt.u32.totalorder %s162_s16, %s268_s0 }
   0x5   :  { %p168_p2 = pnand %p166_p1, %p163_p0 }
   0x7   :  { %171 = shalt.err (!%p168_p2)
}
   0x8   :  { %s172_s21 = scalar_lea.vmem %s16_s13, 256  ;;  %p177_p4 = scmp.lt.s32.totalorder %s16_s13, %s16_s13 }
   0x9   :  { %p173_p3 = scmp.ne.s32.totalorder %s16_s13, %s172_s21  ;;  %p178_p5 = scmp.lt.s32.totalorder %s172_s21, %s172_s21 }
   0xb   :  { %p179_p6 = por %p178_p5, %p177_p4 }
   0xd   :  { %p180_p7 = pnand %p179_p6, %p173_p3 }
   0xf   :  { %183 = shalt.err (!%p180_p7)
}
  0x10   :  { %s211_s22 = smov 128   ;;  %s212_s23 = smov 8  }
  0x11   :  { %21 = dma.hbm_to_vmem [thread:$0]  %s268_s0, 256, %s16_s13, [#allocation3], %s211_s22, %s211_s22, %s212_s23  }
  0x12   :  { %206 = dma.done.wait [#allocation3], 256  }
  0x13   :  { %207 = vsyncadd [#allocation3], 4294967040  ;;  %v213_v0 = vmov 0.0|0.0   ;;  %vm214_vm0 = vmmov 0   ;;  %v215_v1 = vmov 0.0   ;;  %v216_v2 = vmov 0  }
  0x14   :  { %149 = vmatprep.subr.bf16.mxu0 %v213_v0  ;;  %146 = vmatprep.mubr.msk.f32.mxu0 %vm214_vm0, %v215_v1  ;;  %vm39_vm1 = vcmask 326656   ;;  %v31_v3 = vld [vmem:[#allocation2] sm:$0xff]  ;;  %v32_v4 = vld [vmem:[#allocation2 + $0x8] sm:$0xff]  ;;  %s217_s29 = smov [#allocation5]   ;;  %vm119_vm3 = vcmask 124928  }
  0x15   :  { %161 = vset.pattern.permute.xlu0 %v216_v2  ;;  %vm151_vm2 = vmpackc.low %vm39_vm1, %vm39_vm1  ;;  %v150_v5 = vpack.c.bf16 %v32_v4, %v31_v3  ;;  %v33_v6 = vld [vmem:[%s270_s2] sm:$0x7]  ;;  %s127_s30 = sshll.u32 %s217_s29, 4  ;;  %s128_s30 = int_to_ptr.vmem [resolvable:$true] %s127_s30 }
  0x16   :  { %36 = vperm.xlu0 %161, %v33_v6   ;;  %v29_v7 = vld [vmem:[%s269_s1] sm:$0x7]  ;;  %s184_s4 = scalar_lea.vmem %s128_s30, 64  ;;  %p189_p9 = scmp.lt.s32.totalorder %s128_s30, %s128_s30 }
  0x17   :  { %152 = vmatpush3.bf16.xpose.msk.msra.mxu0 %vm151_vm2, %v150_v5  ;;  %v30_v8 = vand.u32 2147483647, %v29_v7  ;;  %p185_p8 = scmp.ne.s32.totalorder %s128_s30, %s184_s4  ;;  %p190_p10 = scmp.lt.s32.totalorder %s184_s4, %s184_s4 }
  0x19   :  { %p191_p11 = por %p190_p10, %p189_p9 }
  0x1b   :  { %p192_p12 = pnand %p191_p11, %p185_p8 }
  0x1e   :  { %147 = vmatmul.mubr.msk.f32.vlgmr.msra.gmra.mrb[0].mxu0 %vm39_vm1, %v30_v8 }
  0x95   :  { %v37_v9 = vpop.permute.xlu0 %36 }
  0xf1   :  { %v115_v10 = vpop.f32.mrb[0].mxu0 }
  0xf2   :  { %v116_v11 = vadd.f32 %v115_v10, %v37_v9  ;;  %v148_v12 = vpop.f32.mrb[1].mxu0 }
  0xf4   :  { %120 = vst.msk [vmem:[#allocation5] sm:$0x7] %vm119_vm3, %v116_v11 }
  0xf5   :  { %195 = shalt.err (!%p192_p12)
}
  0xf6   :  { %s196_s5 = scalar_lea.hbm %s271_s3, 64 }
  0xf7   :  { %p197_p13 = scmp.ne.s32.totalorder %s271_s3, %s196_s5  ;;  %p200_p0 = scmp.lt.u32.totalorder %s196_s5, %s271_s3 }
  0xf9   :  { %p202_p1 = pnand %p200_p0, %p197_p13 }
  0xfb   :  { %205 = shalt.err (!%p202_p1)
}
  0xfc   :  { %130 = dma.vmem_to_hbm [thread:$0]  %s128_s30, 64, %s271_s3, [#allocation4]  }
  0xfd   :  { %208 = dma.done.wait [#allocation4], 64  }
  0xfe   :  { %209 = vsyncadd [#allocation4], 4294967232 }
  0xff   :  { %134 = vsyncpa [#allocation3], 1 }
 0x100   :  { %135 = vsyncpa [#allocation4], 1 }

</bundles_post_ra>
